<compile_context>
chip_gen: v7x
topology: tpu7x:2x2x1
jax: 0.10.0
libtpu: 0.0.40
codegen_flags: <defaults>
</compile_context>

<pallas_src>
import functools

import jax
import jax.numpy as jnp
from jax.experimental import pallas as pl
from jax.experimental.pallas import tpu as pltpu

HIDDEN = 32  # hidden_layer1 == hidden_layer2 == 32 in the PyTorch module


def _round_up(n, m):
    return ((n + m - 1) // m) * m


def _softplus(x):
    # Numerically stable softplus, matches torch.nn.Softplus (beta=1).
    return jnp.maximum(x, 0.0) + jnp.log1p(jnp.exp(-jnp.abs(x)))


def policy_kernel(x_ref, w_ref, b_ref, out_ref, *, s_pad, a_dims, hidden):
    """One batch tile of the full policy forward pass.

    x_ref   : (TB, s_pad)            f32
    w_ref   : (s_pad + 2H, H)        f32   rows [0:s_pad]=W1, [s_pad:s_pad+H]=W2,
                                           [s_pad+H:]=W_head (mean|stddev, zero-padded to H cols)
    b_ref   : (8, H)                 f32   row 0=b1, row 1=b2, row 2=b_head
    out_ref : (TB, 2A)               f32   cols [0:A]=mu, [A:2A]=sigma
    """
    H = hidden
    x = x_ref[...]                       # already f32 (wrapper casts, like x.float())
    w = w_ref[...]
    b = b_ref[...]

    # Sublane-aligned static slices of the packed slabs (free; no copies).
    w1 = w[0:s_pad, :]
    w2 = w[s_pad:s_pad + H, :]
    wh = w[s_pad + H:s_pad + 2 * H, :]
    b1 = b[0:1, :]
    b2 = b[1:2, :]
    bh = b[2:3, :]

    # shared_net: Linear -> Tanh -> Linear -> Tanh (MXU matmuls, f32 accumulation)
    h1 = jnp.tanh(jnp.dot(x, w1, preferred_element_type=jnp.float32) + b1)
    h2 = jnp.tanh(jnp.dot(h1, w2, preferred_element_type=jnp.float32) + b2)

    # Fused heads: one matmul produces [mu | s_pre | zero padding]   (TB, H)
    y = jnp.dot(h2, wh, preferred_element_type=jnp.float32) + bh

    # Apply softplus only to the stddev half (columns >= A); mu columns untouched.
    col = jax.lax.broadcasted_iota(jnp.int32, y.shape, 1)
    y = jnp.where(col >= a_dims, _softplus(y), y)

    out_ref[...] = y[:, :2 * a_dims].astype(out_ref.dtype)


def pack_params(params, s_dims, a_dims):
    """Pack the 8 (in,out)-layout parameter tensors into two padded VMEM slabs."""
    H = HIDDEN
    assert 2 * a_dims <= H, "fused head assumes 2*A <= hidden width (32)"
    s_pad = _round_up(s_dims, 8)

    w1 = jnp.zeros((s_pad, H), jnp.float32).at[:s_dims, :].set(params["w1"])
    w2 = params["w2"].astype(jnp.float32)
    wh = (jnp.zeros((H, H), jnp.float32)
          .at[:, :a_dims].set(params["wm"])
          .at[:, a_dims:2 * a_dims].set(params["ws"]))
    w_slab = jnp.concatenate([w1, w2, wh], axis=0)        # (s_pad + 64, 32)

    b_slab = (jnp.zeros((8, H), jnp.float32)
              .at[0, :].set(params["b1"][0])
              .at[1, :].set(params["b2"][0])
              .at[2, :a_dims].set(params["bm"][0])
              .at[2, a_dims:2 * a_dims].set(params["bs"][0]))
    return w_slab, b_slab


def neural_network_policy_forward(x, w_slab, b_slab, s_dims, a_dims, *, block_b=128):
    """x: (B, S). Returns (mu, sigma), each (B, A) float32."""
    x = x.astype(jnp.float32)                              # matches x.float()
    B, S = x.shape
    H = HIDDEN
    s_pad = _round_up(s_dims, 8)
    two_a = 2 * a_dims

    # Pad the feature axis (zero columns -> zero contribution: W1 pad rows are 0 too).
    if S < s_pad:
        x = jnp.pad(x, ((0, 0), (0, s_pad - S)))

    # Pad the batch to a multiple of the batch tile; grid over batch tiles.
    tb = block_b if B >= block_b else _round_up(max(B, 1), 8)
    b_pad = _round_up(B, tb)
    if b_pad != B:
        x = jnp.pad(x, ((0, b_pad - B), (0, 0)))
    grid = (b_pad // tb,)

    kernel = functools.partial(policy_kernel, s_pad=s_pad, a_dims=a_dims, hidden=H)

    out = pl.pallas_call(
        kernel,
        out_shape=jax.ShapeDtypeStruct((b_pad, two_a), jnp.float32),
        grid=grid,
        in_specs=[
            pl.BlockSpec((tb, s_pad), lambda i: (i, 0)),          # batch tile of x
            pl.BlockSpec(w_slab.shape, lambda i: (0, 0)),         # weights pinned
            pl.BlockSpec(b_slab.shape, lambda i: (0, 0)),         # biases pinned
        ],
        out_specs=pl.BlockSpec((tb, two_a), lambda i: (i, 0)),    # fused mu|sigma
        compiler_params=pltpu.CompilerParams(
            dimension_semantics=("parallel",)),                   # v7x: split batch over TCs
    )(x, w_slab, b_slab)

    out = out[:B]
    return out[:, :a_dims], out[:, a_dims:]


def init_params(key, s_dims, a_dims):
    """Deterministic synthetic parameters (weights stored as (in, out))."""
    ks = jax.random.split(key, 8)
    scale = 0.1
    return {
        "w1": scale * jax.random.normal(ks[0], (s_dims, HIDDEN), jnp.float32),
        "b1": scale * jax.random.normal(ks[1], (1, HIDDEN), jnp.float32),
        "w2": scale * jax.random.normal(ks[2], (HIDDEN, HIDDEN), jnp.float32),
        "b2": scale * jax.random.normal(ks[3], (1, HIDDEN), jnp.float32),
        "wm": scale * jax.random.normal(ks[4], (HIDDEN, a_dims), jnp.float32),
        "bm": scale * jax.random.normal(ks[5], (1, a_dims), jnp.float32),
        "ws": scale * jax.random.normal(ks[6], (HIDDEN, a_dims), jnp.float32),
        "bs": scale * jax.random.normal(ks[7], (1, a_dims), jnp.float32),
    }


def _reference_forward(x, p):
    h1 = jnp.tanh(x @ p["w1"] + p["b1"])
    h2 = jnp.tanh(h1 @ p["w2"] + p["b2"])
    mu = h2 @ p["wm"] + p["bm"]
    sigma = jax.nn.softplus(h2 @ p["ws"] + p["bs"])
    return mu, sigma


if __name__ == "__main__":
    key = jax.random.PRNGKey(0)
    k_x, k_p = jax.random.split(key)

    S_DIMS, A_DIMS = 8, 4          # quad state dim, action dim
    B = 256                        # many environments/timesteps per call (fills sublanes/lanes)

    x = jax.random.normal(k_x, (B, S_DIMS), jnp.float32)
    params = init_params(k_p, S_DIMS, A_DIMS)
    w_slab, b_slab = pack_params(params, S_DIMS, A_DIMS)

    # Batched run (grid over batch, both TCs on v7x).
    mu, sigma = neural_network_policy_forward(x, w_slab, b_slab, S_DIMS, A_DIMS)
    jax.block_until_ready((mu, sigma))

    mu_ref, sigma_ref = _reference_forward(x, params)
    assert mu.shape == (B, A_DIMS) and sigma.shape == (B, A_DIMS)
    assert jnp.allclose(mu, mu_ref, atol=1e-5, rtol=1e-5)
    assert jnp.allclose(sigma, sigma_ref, atol=1e-5, rtol=1e-5)
    assert bool(jnp.all(sigma > 0))        # softplus output strictly positive

    # Also check a tiny ragged batch (padding path), matching the original B=2 usage.
    x2 = x[:2]
    mu2, sigma2 = neural_network_policy_forward(x2, w_slab, b_slab, S_DIMS, A_DIMS)
    jax.block_until_ready((mu2, sigma2))
    mu2_ref, sigma2_ref = _reference_forward(x2, params)
    assert jnp.allclose(mu2, mu2_ref, atol=1e-5, rtol=1e-5)
    assert jnp.allclose(sigma2, sigma2_ref, atol=1e-5, rtol=1e-5)

    print("KERNEL_OK")
</pallas_src>

<mosaic_0001>
module attributes {stable_mosaic.version = 11 : i64} {
  func.func @policy_kernel(%arg0: i32, %arg1: memref<128x8xf32, #tpu.memory_space<vmem>>, %arg2: memref<72x32xf32, #tpu.memory_space<vmem>>, %arg3: memref<8x32xf32, #tpu.memory_space<vmem>>, %arg4: memref<128x8xf32, #tpu.memory_space<vmem>>) attributes {dimension_semantics = [#tpu.dimension_semantics<parallel>], iteration_bounds = array<i64: 2>, scalar_prefetch = 0 : i64, scratch_operands = 0 : i64, tpu.core_type = #tpu.core_type<tc>, window_params = [{transform_indices = @transform_0, window_bounds = array<i64: 128, 8>}, {pipeline_mode = #tpu.pipeline_mode<synchronous>, transform_indices = @transform_1, window_bounds = array<i64: 72, 32>}, {pipeline_mode = #tpu.pipeline_mode<synchronous>, transform_indices = @transform_2, window_bounds = array<i64: 8, 32>}, {transform_indices = @transform_3, window_bounds = array<i64: 128, 8>}]} {
    %c0 = arith.constant 0 : index
    %c0_0 = arith.constant 0 : index
    %0 = vector.load %arg1[%c0, %c0_0] : memref<128x8xf32, #tpu.memory_space<vmem>>, vector<128x8xf32>
    %c0_1 = arith.constant 0 : index
    %c0_2 = arith.constant 0 : index
    %1 = vector.load %arg2[%c0_1, %c0_2] : memref<72x32xf32, #tpu.memory_space<vmem>>, vector<72x32xf32>
    %c0_3 = arith.constant 0 : index
    %c0_4 = arith.constant 0 : index
    %2 = vector.load %arg3[%c0_3, %c0_4] : memref<8x32xf32, #tpu.memory_space<vmem>>, vector<8x32xf32>
    %3 = vector.extract_strided_slice %1 {offsets = [0, 0], sizes = [8, 32], strides = [1, 1]} : vector<72x32xf32> to vector<8x32xf32>
    %4 = vector.extract_strided_slice %1 {offsets = [8, 0], sizes = [32, 32], strides = [1, 1]} : vector<72x32xf32> to vector<32x32xf32>
    %5 = vector.extract_strided_slice %1 {offsets = [40, 0], sizes = [32, 32], strides = [1, 1]} : vector<72x32xf32> to vector<32x32xf32>
    %6 = vector.extract_strided_slice %2 {offsets = [0, 0], sizes = [1, 32], strides = [1, 1]} : vector<8x32xf32> to vector<1x32xf32>
    %7 = vector.extract_strided_slice %2 {offsets = [1, 0], sizes = [1, 32], strides = [1, 1]} : vector<8x32xf32> to vector<1x32xf32>
    %8 = vector.extract_strided_slice %2 {offsets = [2, 0], sizes = [1, 32], strides = [1, 1]} : vector<8x32xf32> to vector<1x32xf32>
    %cst = arith.constant dense<0.000000e+00> : vector<128x32xf32>
    %9 = tpu.matmul %0, %3, %cst {dimension_numbers = #tpu.dot_dimension_numbers<[1], [0], [0], [1], [0, 0, 1, 1], [], []>} : vector<128x8xf32>, vector<8x32xf32>, vector<128x32xf32> -> vector<128x32xf32>
    %10 = vector.broadcast %6 : vector<1x32xf32> to vector<128x32xf32>
    %11 = arith.addf %9, %10 : vector<128x32xf32>
    %12 = math.tanh %11 : vector<128x32xf32>
    %cst_5 = arith.constant dense<0.000000e+00> : vector<128x32xf32>
    %13 = tpu.matmul %12, %4, %cst_5 {dimension_numbers = #tpu.dot_dimension_numbers<[1], [0], [0], [1], [0, 0, 1, 1], [], []>} : vector<128x32xf32>, vector<32x32xf32>, vector<128x32xf32> -> vector<128x32xf32>
    %14 = vector.broadcast %7 : vector<1x32xf32> to vector<128x32xf32>
    %15 = arith.addf %13, %14 : vector<128x32xf32>
    %16 = math.tanh %15 : vector<128x32xf32>
    %cst_6 = arith.constant dense<0.000000e+00> : vector<128x32xf32>
    %17 = tpu.matmul %16, %5, %cst_6 {dimension_numbers = #tpu.dot_dimension_numbers<[1], [0], [0], [1], [0, 0, 1, 1], [], []>} : vector<128x32xf32>, vector<32x32xf32>, vector<128x32xf32> -> vector<128x32xf32>
    %18 = vector.broadcast %8 : vector<1x32xf32> to vector<128x32xf32>
    %19 = arith.addf %17, %18 : vector<128x32xf32>
    %20 = tpu.iota {dimensions = array<i32: 1>} : vector<128x32xi32>
    %c4_i32 = arith.constant 4 : i32
    %21 = vector.broadcast %c4_i32 : i32 to vector<128x32xi32>
    %22 = arith.cmpi sge, %20, %21 : vector<128x32xi32>
    %cst_7 = arith.constant 0.000000e+00 : f32
    %23 = vector.broadcast %cst_7 : f32 to vector<128x32xf32>
    %24 = arith.maximumf %19, %23 : vector<128x32xf32>
    %25 = math.absf %19 : vector<128x32xf32>
    %cst_8 = arith.constant 0.000000e+00 : f32
    %26 = vector.broadcast %cst_8 : f32 to vector<128x32xf32>
    %27 = arith.subf %26, %25 : vector<128x32xf32>
    %28 = math.exp %27 : vector<128x32xf32>
    %29 = math.log1p %28 : vector<128x32xf32>
    %30 = arith.addf %24, %29 : vector<128x32xf32>
    %31 = arith.select %22, %30, %19 : vector<128x32xi1>, vector<128x32xf32>
    %32 = vector.extract_strided_slice %31 {offsets = [0, 0], sizes = [128, 8], strides = [1, 1]} : vector<128x32xf32> to vector<128x8xf32>
    %c0_9 = arith.constant 0 : index
    %c0_10 = arith.constant 0 : index
    %33 = vector.load %arg4[%c0_9, %c0_10] : memref<128x8xf32, #tpu.memory_space<vmem>>, vector<128x8xf32>
    tpu.vector_store %arg4[%c0_9, %c0_10], %32 {strides = array<i32>} : memref<128x8xf32, #tpu.memory_space<vmem>>, vector<128x8xf32>,
    return
  }
  func.func @transform_0(%arg0: i32) -> (i32, i32) {
    %c0_i32 = arith.constant 0 : i32
    %c0_i32_0 = arith.constant 0 : i32
    return %arg0, %c0_i32 : i32, i32
  }
  func.func @transform_1(%arg0: i32) -> (i32, i32) {
    %c0_i32 = arith.constant 0 : i32
    %c0_i32_0 = arith.constant 0 : i32
    %c0_i32_1 = arith.constant 0 : i32
    return %c0_i32, %c0_i32_0 : i32, i32
  }
  func.func @transform_2(%arg0: i32) -> (i32, i32) {
    %c0_i32 = arith.constant 0 : i32
    %c0_i32_0 = arith.constant 0 : i32
    %c0_i32_1 = arith.constant 0 : i32
    return %c0_i32, %c0_i32_0 : i32, i32
  }
  func.func @transform_3(%arg0: i32) -> (i32, i32) {
    %c0_i32 = arith.constant 0 : i32
    %c0_i32_0 = arith.constant 0 : i32
    return %arg0, %c0_i32 : i32, i32
  }
}

</mosaic_0001>

<bundles_post_ra>
// kernel: tpu_custom_call.1
= control target key start
LH: loop header
LB: loop body
LE: loop exit
PB: predicated region body
PF: predicated region fallthrough
CT: control target
= control target key end

     0   :  { %s1544_s12 = smov 0   ;;  %s1968_s0 = inlined_call_operand.vmem [shape: f32[256,8], index: 0, kind: input, shape index: {}]   ;;  %s1969_s1 = inlined_call_operand.vmem [shape: f32[72,32], index: 1, kind: input, shape index: {}]   ;;  %s1970_s2 = inlined_call_operand.vmem [shape: f32[8,32], index: 2, kind: input, shape index: {}]   ;;  %s1971_s3 = inlined_call_operand.vmem [shape: f32[256,8], index: 3, kind: output, shape index: {}]  }
   0x1 LB: > { %s1156_s13 = sadd.s32 4294967295, %s1522_s12   ;;  %p1160_p0 = scmp.ge.s32.totalorder %s1522_s12, 1  ;;  %s1522_s12 = sphi %s1544_s12, %s13_s12  }
   0x2   : > { %p138_p1 = scmp.lt.s32.totalorder %s1522_s12, 3 }
   0x4   : > { %p139_p2 = pnand %p1160_p0, %p138_p1 }
   0x5   : > { %v190_v0 = vld [vmem:[%s1969_s1] sm:$0xff] (!%p139_p2)  ;;  %s1161_s16 = sshll.u32 (!%p139_p2), %s1156_s13, 4  ;;  %v191_v1 = vld [vmem:[%s1969_s1 + $0x8] sm:$0xff] (!%p139_p2)  ;;  %v192_v2 = vld [vmem:[%s1969_s1 + $0x10] sm:$0xff] (!%p139_p2)  ;;  %vm204_vm0 = vcmask (!%p139_p2), 64512   ;;  %v200_v26 = vlaneseq (!%p139_p2)  ;;  %vm418_vm1 = vcmask (!%p139_p2), 261120  }
   0x6   : > { %142 = sbr.rel (%p139_p2) target bundleno = 779 (0x30b), region = 32  ;;  %1272 = vmatprep.subr.mxu0 (!%p139_p2), %v190_v0  ;;  %p163_p3 = scmp.lt.s32.totalorder (!%p139_p2), %s1161_s16, 31  ;;  %1378 = vmatprep.subr.mxu1 (!%p139_p2), %v190_v0  ;;  %v1362_v3 = vpack.c.bf16 (!%p139_p2), %v192_v2, %v191_v1  ;;  %v193_v20 = vld [vmem:[%s1969_s1 + $0x18] sm:$0xff] (!%p139_p2)  ;;  %v194_v21 = vld [vmem:[%s1969_s1 + $0x20] sm:$0xff] (!%p139_p2)  ;;  %v195_v23 = vld [vmem:[%s1969_s1 + $0x28] sm:$0xff] (!%p139_p2) }
   0x7   : > { %1273 = vmatpush3.msra.mxu0 (!%p139_p2), %v190_v0  ;;  %1379 = vmatpush3.msra.mxu1 (!%p139_p2), %v190_v0  ;;  %v1366_v22 = vpack.c.bf16 (!%p139_p2), %v194_v21, %v193_v20  ;;  %v196_v24 = vld [vmem:[%s1969_s1 + $0x30] sm:$0xff] (!%p139_p2)  ;;  %v1616_v27 = vshrl.u32 (!%p139_p2), %v200_v26, 7  ;;  %v1622_v29 = vld [vmem:[%s1970_s2] sm:$0xff] (!%p139_p2) }
   0x8   : > { %1363 = vmatprep.subr.bf16.mxu1 (!%p139_p2), %v1362_v3  ;;  %v1370_v25 = vpack.c.bf16 (!%p139_p2), %v196_v24, %v195_v23 }
   0x9   : > { %v202_v28 = vsub.s32 (!%p139_p2), 0, %v1616_v27 }
   0xa   : > { %1371 = vmatprep.subr.bf16.mxu0 (!%p139_p2), %v1370_v25 }
   0xb   : > { %v1625_v30 = vrot.slane (!%p139_p2), %v1622_v29, %v202_v28 }
   0xd   : > { %s1985_s16 = smov (!%p163_p3, %s1161_s16), 31 }
   0xe   : > { %s1162_s21 = sshll.u32 %s1985_s16, 3 }
   0xf   : > { %s1569_s24 = scalar_lea.vmem %s1968_s0, %s1162_s21  ;;  %s1805_s15 = scalar_lea.vmem %s1971_s3, %s1162_s21 }
  0x10   : > { %v174_v4 = vld [vmem:[%s1569_s24] sm:$0xff]  ;;  %v175_v5 = vld [vmem:[%s1569_s24 + $0x8] sm:$0xff]  ;;  %v176_v6 = vld [vmem:[%s1569_s24 + $0x10] sm:$0xff] }
  0x11   : > { %1274 = vmatprep.mubr.msk.f32.mxu0 %vm204_vm0, %v174_v4  ;;  %v182_v7 = vld [vmem:[%s1569_s24 + $0x40] sm:$0xff]  ;;  %v177_v8 = vld [vmem:[%s1569_s24 + $0x18] sm:$0xff]  ;;  %v183_v9 = vld [vmem:[%s1569_s24 + $0x48] sm:$0xff] }
  0x12   : > { %1275 = vmatmul.mubr.msk.f32.vlgmr.msra.gmra.mrb[0].mxu0 %vm204_vm0, %v175_v5  ;;  %1286 = vmatprep.mubr.msk.f32.mxu1 %vm204_vm0, %v182_v7  ;;  %v184_v10 = vld [vmem:[%s1569_s24 + $0x50] sm:$0xff]  ;;  %v178_v11 = vld [vmem:[%s1569_s24 + $0x20] sm:$0xff]  ;;  %v185_v12 = vld [vmem:[%s1569_s24 + $0x58] sm:$0xff] }
  0x13   : > { %1277 = vmatprep.mubr.msk.f32.mxu0 %vm204_vm0, %v176_v6  ;;  %1287 = vmatmul.mubr.msk.f32.vlgmr.msra.gmra.mrb[0].mxu1 %vm204_vm0, %v183_v9  ;;  %v186_v13 = vld [vmem:[%s1569_s24 + $0x60] sm:$0xff]  ;;  %v179_v14 = vld [vmem:[%s1569_s24 + $0x28] sm:$0xff]  ;;  %v180_v15 = vld [vmem:[%s1569_s24 + $0x30] sm:$0xff] }
  0x14   : > { %1289 = vmatprep.mubr.msk.f32.mxu1 %vm204_vm0, %v184_v10  ;;  %1365 = vmatpush3.bf16.msra.mxu1 %v1362_v3  ;;  %v187_v16 = vld [vmem:[%s1569_s24 + $0x68] sm:$0xff]  ;;  %v188_v17 = vld [vmem:[%s1569_s24 + $0x70] sm:$0xff]  ;;  %v181_v18 = vld [vmem:[%s1569_s24 + $0x38] sm:$0xff] }
  0x15   : > { %v189_v19 = vld [vmem:[%s1569_s24 + $0x78] sm:$0xff]  ;;  %1367 = vmatprep.subr.bf16.mxu1 %v1366_v22  ;;  %1373 = vmatpush3.bf16.msra.mxu0 %v1370_v25 }
  0x16   : > { %1278 = vmatmul.mubr.msk.f32.gmra.mrb[2].mxu0 %vm204_vm0, %v177_v8 }
  0x17   : > { %1280 = vmatprep.mubr.msk.f32.mxu0 %vm204_vm0, %v178_v11  ;;  %1290 = vmatmul.mubr.msk.f32.gmra.mrb[2].mxu1 %vm204_vm0, %v185_v12 }
  0x18   : > { %1292 = vmatprep.mubr.msk.f32.mxu1 %vm204_vm0, %v186_v13  ;;  %1369 = vmatpush3.bf16.msra.mxu1 %v1366_v22 }
  0x1a   : > { %1281 = vmatmul.mubr.msk.f32.gmra.mrb[4].mxu0 %vm204_vm0, %v179_v14 }
  0x1b   : > { %1283 = vmatprep.mubr.msk.f32.mxu0 %vm204_vm0, %v180_v15  ;;  %1293 = vmatmul.mubr.msk.f32.gmra.mrb[4].mxu1 %vm204_vm0, %v187_v16  ;;  %v197_v15 = vld [vmem:[%s1969_s1 + $0x38] sm:$0xff]  ;;  %v198_v16 = vld [vmem:[%s1969_s1 + $0x40] sm:$0xff] }
  0x1c   : > { %1295 = vmatprep.mubr.msk.f32.mxu1 %vm204_vm0, %v188_v17  ;;  %v1374_v17 = vpack.c.bf16 %v198_v16, %v197_v15 }
  0x1e   : > { %1284 = vmatmul.mubr.msk.f32.gmra.mrb[6].mxu0 %vm204_vm0, %v181_v18  ;;  %1375 = vmatprep.subr.bf16.mxu0 %v1374_v17  ;;  %v416_v18 = vsub.s32 1, %v1616_v27 }
  0x1f   : > { %1296 = vmatmul.mubr.msk.f32.gmra.mrb[6].mxu1 %vm204_vm0, %v189_v19  ;;  %1377 = vmatpush3.bf16.msra.mxu0 %v1374_v17 }
  0x20   : > { %v1667_v19 = vrot.slane %v1622_v29, %v416_v18 }
  0xe5   : > { %v1276_v31 = vpop.f32.mrb[0].mxu0 }
  0xe6   : > { %v325_v32 = vadd.f32 %v1276_v31, %v1625_v30  ;;  %v319_v33 = vpop.f32.mrb[1].mxu0  ;;  %v1288_v35 = vpop.f32.mrb[0].mxu1 }
  0xe7   : > { %v320_v34 = vadd.f32 %v319_v33, %v1625_v30  ;;  %v359_v36 = vpop.f32.mrb[1].mxu1  ;;  %v365_v59 = vadd.f32 %v1288_v35, %v1625_v30 }
  0xe8   : > { %v360_v48 = vadd.f32 %v359_v36, %v1625_v30 }
  0xe9   : > { %1388 = vtanh.f32 %v320_v34  ;;  %v1279_v37 = vpop.f32.mrb[2].mxu0 }
  0xea   : > { %1390 = vtanh.f32 %v325_v32  ;;  %v335_v38 = vadd.f32 %v1279_v37, %v1625_v30  ;;  %v329_v39 = vpop.f32.mrb[3].mxu0  ;;  %v1291_v41 = vpop.f32.mrb[2].mxu1 }
  0xeb   : > { %v330_v40 = vadd.f32 %v329_v39, %v1625_v30  ;;  %v369_v42 = vpop.f32.mrb[3].mxu1  ;;  %v375_v63 = vadd.f32 %v1291_v41, %v1625_v30 }
  0xec   : > { %v370_v58 = vadd.f32 %v369_v42, %v1625_v30 }
  0xed   : > { %1392 = vtanh.f32 %v330_v40  ;;  %v1282_v43 = vpop.f32.mrb[4].mxu0 }
  0xee   : > { %1394 = vtanh.f32 %v335_v38  ;;  %v345_v44 = vadd.f32 %v1282_v43, %v1625_v30  ;;  %v339_v45 = vpop.f32.mrb[5].mxu0  ;;  %v1294_v47 = vpop.f32.mrb[4].mxu1 }
  0xef   : > { %v340_v46 = vadd.f32 %v339_v45, %v1625_v30  ;;  %v379_v49 = vpop.f32.mrb[5].mxu1  ;;  %v385_v4 = vadd.f32 %v1294_v47, %v1625_v30 }
  0xf0   : > { %v380_v62 = vadd.f32 %v379_v49, %v1625_v30 }
  0xf1   : > { %1396 = vtanh.f32 %v340_v46  ;;  %v1285_v50 = vpop.f32.mrb[6].mxu0 }
  0xf2   : > { %1398 = vtanh.f32 %v345_v44  ;;  %v355_v51 = vadd.f32 %v1285_v50, %v1625_v30  ;;  %v349_v52 = vpop.f32.mrb[7].mxu0  ;;  %v1297_v55 = vpop.f32.mrb[6].mxu1 }
  0xf3   : > { %v1389_v53 = vpop.eup %1388  ;;  %v350_v54 = vadd.f32 %v349_v52, %v1625_v30  ;;  %1400 = vtanh.f32 %v360_v48  ;;  %v389_v57 = vpop.f32.mrb[7].mxu1  ;;  %v395_v7 = vadd.f32 %v1297_v55, %v1625_v30 }
  0xf4   : > { %v1391_v56 = vpop.eup %1390  ;;  %1306 = vmatprep.mubr.msk.f32.mxu1 %vm418_vm1, %v1389_v53  ;;  %v390_v2 = vadd.f32 %v389_v57, %v1625_v30 }
  0xf5   : > { %1402 = vtanh.f32 %v350_v54  ;;  %1307 = vmatmul.mubr.msk.f32.vlgmr.msra.gmra.mrb[8].mxu1 %vm418_vm1, %v1391_v56 }
  0xf6   : > { %1404 = vtanh.f32 %v355_v51 }
  0xf7   : > { %v1393_v60 = vpop.eup %1392  ;;  %1406 = vtanh.f32 %v370_v58 }
  0xf8   : > { %v1395_v61 = vpop.eup %1394  ;;  %1309 = vmatprep.mubr.msk.f32.mxu1 %vm418_vm1, %v1393_v60  ;;  %1408 = vtanh.f32 %v365_v59 }
  0xf9   : > { %1310 = vmatmul.mubr.msk.f32.gmra.mrb[10].mxu1 %vm418_vm1, %v1395_v61  ;;  %1410 = vtanh.f32 %v380_v62 }
  0xfa   : > { %1412 = vtanh.f32 %v375_v63 }
  0xfb   : > { %v1397_v0 = vpop.eup %1396  ;;  %1414 = vtanh.f32 %v390_v2 }
  0xfc   : > { %v1399_v1 = vpop.eup %1398  ;;  %1312 = vmatprep.mubr.msk.f32.mxu1 %vm418_vm1, %v1397_v0  ;;  %1416 = vtanh.f32 %v385_v4 }
  0xfd   : > { %1313 = vmatmul.mubr.msk.f32.gmra.mrb[12].mxu1 %vm418_vm1, %v1399_v1  ;;  %v1401_v3 = vpop.eup %1400  ;;  %1418 = vtanh.f32 %v395_v7  ;;  %v630_v7 = vsub.s32 2, %v1616_v27 }
  0xff   : > { %v1403_v5 = vpop.eup %1402 }
 0x100   : > { %v1405_v6 = vpop.eup %1404  ;;  %1315 = vmatprep.mubr.msk.f32.mxu1 %vm418_vm1, %v1403_v5 }
 0x101   : > { %1316 = vmatmul.mubr.msk.f32.gmra.mrb[14].mxu1 %vm418_vm1, %v1405_v6  ;;  %v1407_v8 = vpop.eup %1406 }
 0x102   : > { %1318 = vmatprep.mubr.msk.f32.mxu1 %vm418_vm1, %v1401_v3  ;;  %v1409_v9 = vpop.eup %1408 }
 0x103   : > { %v1411_v10 = vpop.eup %1410 }
 0x104   : > { %v1413_v11 = vpop.eup %1412 }
 0x105   : > { %1319 = vmatmul.mubr.msk.f32.gmra.mrb[16].mxu1 %vm418_vm1, %v1409_v9  ;;  %v1415_v12 = vpop.eup %1414 }
 0x106   : > { %1321 = vmatprep.mubr.msk.f32.mxu1 %vm418_vm1, %v1407_v8  ;;  %v1417_v13 = vpop.eup %1416  ;;  %v1703_v8 = vrot.slane %v1622_v29, %v630_v7 }
 0x107   : > { %v1419_v14 = vpop.eup %1418 }
 0x109   : > { %1322 = vmatmul.mubr.msk.f32.gmra.mrb[18].mxu1 %vm418_vm1, %v1413_v11 }
 0x10a   : > { %1324 = vmatprep.mubr.msk.f32.mxu1 %vm418_vm1, %v1411_v10 }
 0x10d   : > { %1325 = vmatmul.mubr.msk.f32.gmra.mrb[20].mxu1 %vm418_vm1, %v1417_v13 }
 0x10e   : > { %1327 = vmatprep.mubr.msk.f32.mxu1 %vm418_vm1, %v1415_v12 }
 0x111   : > { %1328 = vmatmul.mubr.msk.f32.gmra.mrb[22].mxu1 %vm418_vm1, %v1419_v14 }
 0x1c8   : > { %v1308_v20 = vpop.f32.mrb[8].mxu1 }
 0x1c9   : > { %v539_v21 = vadd.f32 %v1308_v20, %v1667_v19  ;;  %v533_v22 = vpop.f32.mrb[9].mxu1 }
 0x1ca   : > { %v534_v23 = vadd.f32 %v533_v22, %v1667_v19 }
 0x1cc   : > { %1420 = vtanh.f32 %v534_v23  ;;  %v1311_v24 = vpop.f32.mrb[10].mxu1 }
 0x1cd   : > { %1422 = vtanh.f32 %v539_v21  ;;  %v549_v25 = vadd.f32 %v1311_v24, %v1667_v19  ;;  %v543_v28 = vpop.f32.mrb[11].mxu1 }
 0x1ce   : > { %v544_v30 = vadd.f32 %v543_v28, %v1667_v19 }
 0x1d0   : > { %1424 = vtanh.f32 %v544_v30  ;;  %v1314_v31 = vpop.f32.mrb[12].mxu1 }
 0x1d1   : > { %1426 = vtanh.f32 %v549_v25  ;;  %v559_v32 = vadd.f32 %v1314_v31, %v1667_v19  ;;  %v553_v33 = vpop.f32.mrb[13].mxu1 }
 0x1d2   : > { %v554_v34 = vadd.f32 %v553_v33, %v1667_v19 }
 0x1d4   : > { %1428 = vtanh.f32 %v554_v34  ;;  %v1317_v35 = vpop.f32.mrb[14].mxu1 }
 0x1d5   : > { %1430 = vtanh.f32 %v559_v32  ;;  %v569_v36 = vadd.f32 %v1317_v35, %v1667_v19  ;;  %v563_v37 = vpop.f32.mrb[15].mxu1 }
 0x1d6   : > { %v1421_v38 = vpop.eup %1420  ;;  %v564_v39 = vadd.f32 %v563_v37, %v1667_v19 }
 0x1d7   : > { %v1423_v40 = vpop.eup %1422  ;;  %1338 = vmatprep.mubr.msk.f32.mxu0 %vm418_vm1, %v1421_v38 }
 0x1d8   : > { %1432 = vtanh.f32 %v564_v39  ;;  %v1320_v41 = vpop.f32.mrb[16].mxu1  ;;  %1339 = vmatmul.mubr.msk.f32.vlgmr.msra.gmra.mrb[8].mxu0 %vm418_vm1, %v1423_v40 }
 0x1d9   : > { %1434 = vtanh.f32 %v569_v36  ;;  %v579_v42 = vadd.f32 %v1320_v41, %v1667_v19  ;;  %v573_v43 = vpop.f32.mrb[17].mxu1 }
 0x1da   : > { %v1425_v44 = vpop.eup %1424  ;;  %v574_v45 = vadd.f32 %v573_v43, %v1667_v19 }
 0x1db   : > { %v1427_v46 = vpop.eup %1426  ;;  %1341 = vmatprep.mubr.msk.f32.mxu0 %vm418_vm1, %v1425_v44 }
 0x1dc   : > { %1436 = vtanh.f32 %v574_v45  ;;  %v1323_v47 = vpop.f32.mrb[18].mxu1  ;;  %1342 = vmatmul.mubr.msk.f32.gmra.mrb[10].mxu0 %vm418_vm1, %v1427_v46 }
 0x1dd   : > { %1438 = vtanh.f32 %v579_v42  ;;  %v589_v48 = vadd.f32 %v1323_v47, %v1667_v19  ;;  %v583_v49 = vpop.f32.mrb[19].mxu1 }
 0x1de   : > { %v1429_v50 = vpop.eup %1428  ;;  %v584_v51 = vadd.f32 %v583_v49, %v1667_v19 }
 0x1df   : > { %v1431_v52 = vpop.eup %1430  ;;  %1344 = vmatprep.mubr.msk.f32.mxu0 %vm418_vm1, %v1429_v50  ;;  %v1738_v50 = vand.u32 127, %v200_v26 }
 0x1e0   : > { %1440 = vtanh.f32 %v584_v51  ;;  %v1326_v53 = vpop.f32.mrb[20].mxu1  ;;  %1345 = vmatmul.mubr.msk.f32.gmra.mrb[12].mxu0 %vm418_vm1, %v1431_v52 }
 0x1e1   : > { %1442 = vtanh.f32 %v589_v48  ;;  %v599_v54 = vadd.f32 %v1326_v53, %v1667_v19  ;;  %v593_v55 = vpop.f32.mrb[21].mxu1  ;;  %vm827_vm2 = vcmp.ge.s32.totalorder %v1738_v50, 4 }
 0x1e2   : > { %v1433_v56 = vpop.eup %1432  ;;  %v594_v57 = vadd.f32 %v593_v55, %v1667_v19 }
 0x1e3   : > { %v1435_v58 = vpop.eup %1434  ;;  %1347 = vmatprep.mubr.msk.f32.mxu0 %vm418_vm1, %v1433_v56 }
 0x1e4   : > { %1444 = vtanh.f32 %v594_v57  ;;  %v1329_v59 = vpop.f32.mrb[22].mxu1  ;;  %1348 = vmatmul.mubr.msk.f32.gmra.mrb[14].mxu0 %vm418_vm1, %v1435_v58 }
 0x1e5   : > { %1446 = vtanh.f32 %v599_v54  ;;  %v609_v60 = vadd.f32 %v1329_v59, %v1667_v19  ;;  %v603_v61 = vpop.f32.mrb[23].mxu1 }
 0x1e6   : > { %v1437_v62 = vpop.eup %1436  ;;  %v604_v63 = vadd.f32 %v603_v61, %v1667_v19 }
 0x1e7   : > { %v1439_v0 = vpop.eup %1438  ;;  %1350 = vmatprep.mubr.msk.f32.mxu0 %vm418_vm1, %v1437_v62 }
 0x1e8   : > { %1448 = vtanh.f32 %v604_v63  ;;  %1351 = vmatmul.mubr.msk.f32.gmra.mrb[16].mxu0 %vm418_vm1, %v1439_v0 }
 0x1e9   : > { %1450 = vtanh.f32 %v609_v60 }
 0x1ea   : > { %v1441_v1 = vpop.eup %1440 }
 0x1eb   : > { %v1443_v2 = vpop.eup %1442  ;;  %1353 = vmatprep.mubr.msk.f32.mxu0 %vm418_vm1, %v1441_v1 }
 0x1ec   : > { %1354 = vmatmul.mubr.msk.f32.gmra.mrb[18].mxu0 %vm418_vm1, %v1443_v2 }
 0x1ee   : > { %v1445_v3 = vpop.eup %1444 }
 0x1ef   : > { %v1447_v4 = vpop.eup %1446  ;;  %1356 = vmatprep.mubr.msk.f32.mxu0 %vm418_vm1, %v1445_v3 }
 0x1f0   : > { %1357 = vmatmul.mubr.msk.f32.gmra.mrb[20].mxu0 %vm418_vm1, %v1447_v4 }
 0x1f2   : > { %v1449_v5 = vpop.eup %1448 }
 0x1f3   : > { %v1451_v6 = vpop.eup %1450  ;;  %1359 = vmatprep.mubr.msk.f32.mxu0 %vm418_vm1, %v1449_v5 }
 0x1f4   : > { %1360 = vmatmul.mubr.msk.f32.gmra.mrb[22].mxu0 %vm418_vm1, %v1451_v6 }
 0x2ab   : > { %v1340_v9 = vpop.f32.mrb[8].mxu0 }
 0x2ac   : > { %v1706_v10 = vadd.f32 %v1340_v9, %v1703_v8  ;;  %v746_v11 = vpop.f32.mrb[9].mxu0 }
 0x2ad   : > { %v1709_v12 = vadd.f32 %v746_v11, %v1703_v8 }
 0x2ae   : > { %v845_v13 = vand.u32 2147483647, %v1706_v10  ;;  %v829_v54 = vmax.f32 %v1706_v10, 0.0 }
 0x2af   : > { %v844_v14 = vand.u32 2147483647, %v1709_v12  ;;  %v1343_v15 = vpop.f32.mrb[10].mxu0  ;;  %v828_v56 = vmax.f32 %v1709_v12, 0.0 }
 0x2b0   : > { %v861_v16 = vsub.f32 0.0, %v845_v13  ;;  %v1714_v17 = vadd.f32 %v1343_v15, %v1703_v8  ;;  %v756_v27 = vpop.f32.mrb[11].mxu0 }
 0x2b1   : > { %v860_v29 = vsub.f32 0.0, %v844_v14  ;;  %v1717_v18 = vadd.f32 %v756_v27, %v1703_v8 }
 0x2b2   : > { %v878_v19 = vmul.f32 1.442695, %v861_v16  ;;  %v847_v20 = vand.u32 2147483647, %v1714_v17  ;;  %v831_v57 = vmax.f32 %v1714_v17, 0.0 }
 0x2b3   : > { %v876_v21 = vmul.f32 1.442695, %v860_v29  ;;  %v846_v22 = vand.u32 2147483647, %v1717_v18  ;;  %v1346_v23 = vpop.f32.mrb[12].mxu0  ;;  %v830_v26 = vmax.f32 %v1717_v18, 0.0 }
 0x2b4   : > { %1452 = vpow2.f32 %v878_v19  ;;  %v863_v24 = vsub.f32 0.0, %v847_v20  ;;  %v1722_v25 = vadd.f32 %v1346_v23, %v1703_v8  ;;  %v766_v28 = vpop.f32.mrb[13].mxu0 }
 0x2b5   : > { %1454 = vpow2.f32 %v876_v21  ;;  %v862_v30 = vsub.f32 0.0, %v846_v22  ;;  %v1725_v31 = vadd.f32 %v766_v28, %v1703_v8 }
 0x2b6   : > { %v882_v32 = vmul.f32 1.442695, %v863_v24  ;;  %v849_v33 = vand.u32 2147483647, %v1722_v25  ;;  %v833_v62 = vmax.f32 %v1722_v25, 0.0 }
 0x2b7   : > { %v880_v34 = vmul.f32 1.442695, %v862_v30  ;;  %v848_v35 = vand.u32 2147483647, %v1725_v31  ;;  %v1349_v36 = vpop.f32.mrb[14].mxu0  ;;  %v832_v11 = vmax.f32 %v1725_v31, 0.0 }
 0x2b8   : > { %1456 = vpow2.f32 %v882_v32  ;;  %v865_v37 = vsub.f32 0.0, %v849_v33  ;;  %v1730_v38 = vadd.f32 %v1349_v36, %v1703_v8  ;;  %v776_v39 = vpop.f32.mrb[15].mxu0 }
 0x2b9   : > { %1458 = vpow2.f32 %v880_v34  ;;  %v864_v40 = vsub.f32 0.0, %v848_v35  ;;  %v1733_v41 = vadd.f32 %v776_v39, %v1703_v8 }
 0x2ba   : > { %v886_v42 = vmul.f32 1.442695, %v865_v37  ;;  %v851_v43 = vand.u32 2147483647, %v1730_v38  ;;  %v835_v20 = vmax.f32 %v1730_v38, 0.0 }
 0x2bb   : > { %v884_v44 = vmul.f32 1.442695, %v864_v40  ;;  %v1352_v45 = vpop.f32.mrb[16].mxu0  ;;  %v850_v48 = vand.u32 2147483647, %v1733_v41 }
 0x2bc   : > { %1460 = vpow2.f32 %v886_v42  ;;  %v867_v46 = vsub.f32 0.0, %v851_v43  ;;  %v786_v47 = vpop.f32.mrb[17].mxu0  ;;  %v1741_v52 = vadd.f32 %v1352_v45, %v1703_v8 }
 0x2bd   : > { %1462 = vpow2.f32 %v884_v44  ;;  %v866_v63 = vsub.f32 0.0, %v850_v48  ;;  %v1752_v4 = vadd.f32 %v786_v47, %v1703_v8 }
 0x2be   : > { %v1453_v49 = vpop.eup %1452  ;;  %v890_v51 = vmul.f32 1.442695, %v867_v46  ;;  %v853_v3 = vand.u32 2147483647, %v1741_v52 }
 0x2bf   : > { %v1455_v53 = vpop.eup %1454  ;;  %v917_v55 = vadd.f32 1.0, %v1453_v49  ;;  %v920_v58 = vmul.f32 -0.5, %v1453_v49  ;;  %v1355_v61 = vpop.f32.mrb[18].mxu0  ;;  %v923_v2 = vand.u32 2147483647, %v1453_v49 }
 0x2c0   : > { %v908_v59 = vadd.f32 1.0, %v1455_v53  ;;  %v911_v60 = vmul.f32 -0.5, %v1455_v53  ;;  %1464 = vpow2.f32 %v890_v51  ;;  %v1748_v0 = vpop.f32.mrb[19].mxu0  ;;  %v914_v6 = vand.u32 2147483647, %v1455_v53 }
 0x2c1   : > { %1466 = vlog2.f32 %v917_v55  ;;  %v921_v14 = vadd.f32 1.0, %v920_v58  ;;  %v888_v21 = vmul.f32 1.442695, %v866_v63  ;;  %vm1761_vm3 = vcmp.lt.f32.partialorder %v923_v2, 0.0004427343 }
 0x2c2   : > { %v1457_v1 = vpop.eup %1456  ;;  %1468 = vlog2.f32 %v908_v59  ;;  %v912_v15 = vadd.f32 1.0, %v911_v60  ;;  %v869_v24 = vsub.f32 0.0, %v853_v3  ;;  %v852_v28 = vand.u32 2147483647, %v1752_v4 }
 0x2c3   : > { %v1459_v5 = vpop.eup %1458  ;;  %v935_v7 = vadd.f32 1.0, %v1457_v1  ;;  %v938_v9 = vmul.f32 -0.5, %v1457_v1  ;;  %v1755_v13 = vpop.f32.mrb[20].mxu0  ;;  %v941_v19 = vand.u32 2147483647, %v1457_v1  ;;  %v922_v37 = vmul.f32 %v1453_v49, %v921_v14 }
 0x2c4   : > { %v926_v16 = vadd.f32 1.0, %v1459_v5  ;;  %v929_v27 = vmul.f32 -0.5, %v1459_v5  ;;  %v1757_v29 = vpop.f32.mrb[21].mxu0  ;;  %v932_v34 = vand.u32 2147483647, %v1459_v5  ;;  %v913_v39 = vmul.f32 %v1455_v53, %v912_v15 }
 0x2c5   : > { %1470 = vlog2.f32 %v935_v7  ;;  %v939_v32 = vadd.f32 1.0, %v938_v9  ;;  %vm1770_vm4 = vcmp.lt.f32.partialorder %v914_v6, 0.0004427343  ;;  %vm1777_vm5 = vcmp.lt.f32.partialorder %v941_v19, 0.0004427343 }
 0x2c6   : > { %v1461_v22 = vpop.eup %1460  ;;  %1472 = vlog2.f32 %v926_v16  ;;  %v930_v33 = vadd.f32 1.0, %v929_v27  ;;  %v868_v47 = vsub.f32 0.0, %v852_v28  ;;  %v894_v51 = vmul.f32 1.442695, %v869_v24 }
 0x2c7   : > { %v1766_v30 = vpop.eup %1462  ;;  %v953_v35 = vadd.f32 1.0, %v1461_v22  ;;  %v1768_v36 = vpop.f32.mrb[22].mxu0  ;;  %v956_v45 = vmul.f32 -0.5, %v1461_v22  ;;  %v959_v46 = vand.u32 2147483647, %v1461_v22  ;;  %v1785_v53 = vadd.f32 %v1355_v61, %v1703_v8 }
 0x2c8   : > { %v944_v42 = vadd.f32 1.0, %v1766_v30  ;;  %v1775_v43 = vpop.f32.mrb[23].mxu0  ;;  %v947_v49 = vmul.f32 -0.5, %v1766_v30  ;;  %v940_v58 = vmul.f32 %v1457_v1, %v939_v32  ;;  %v931_v59 = vmul.f32 %v1459_v5, %v930_v33 }
 0x2c9   : > { %1474 = vlog2.f32 %v953_v35  ;;  %vm1787_vm6 = vcmp.lt.f32.partialorder %v932_v34, 0.0004427343  ;;  %v950_v6 = vand.u32 2147483647, %v1766_v30  ;;  %v892_v7 = vmul.f32 1.442695, %v868_v47 }
 0x2ca   : > { %v1781_v48 = vpop.eup %1464  ;;  %1476 = vlog2.f32 %v944_v42  ;;  %v957_v14 = vadd.f32 1.0, %v956_v45  ;;  %vm1793_vm7 = vcmp.lt.f32.partialorder %v959_v46, 0.0004427343  ;;  %v948_v5 = vadd.f32 1.0, %v947_v49 }
 0x2cb   : > { %v1467_v55 = vpop.eup %1466  ;;  %v971_v63 = vadd.f32 1.0, %v1781_v48  ;;  %1478 = vpow2.f32 %v888_v21  ;;  %v855_v15 = vand.u32 2147483647, %v1785_v53  ;;  %v974_v21 = vmul.f32 -0.5, %v1781_v48 }
 0x2cc   : > { %v1469_v2 = vpop.eup %1468  ;;  %v919_v3 = vmul.f32 0.6931472, %v1467_v55  ;;  %v1816_v33 = vadd.f32 %v1748_v0, %v1703_v8  ;;  %v958_v35 = vmul.f32 %v1461_v22, %v957_v14  ;;  %vm951_vm8 = vcmp.lt.f32.partialorder %v950_v6, 0.0004427343 }
 0x2cd   : > { %v910_v9 = vmul.f32 0.6931472, %v1469_v2  ;;  %1480 = vlog2.f32 %v971_v63  ;;  %v871_v32 = vsub.f32 0.0, %v855_v15  ;;  %v975_v22 = vadd.f32 1.0, %v974_v21 }
 0x2ce   : > { %v925_v1 = vsel %vm1761_vm3, %v922_v37, %v919_v3  ;;  %1482 = vpow2.f32 %v894_v51  ;;  %v1823_v37 = vadd.f32 %v1755_v13, %v1703_v8  ;;  %v854_v45 = vand.u32 2147483647, %v1816_v33 }
 0x2cf   : > { %v1471_v16 = vpop.eup %1470  ;;  %v1053_v27 = vadd.f32 %v925_v1, %v829_v54  ;;  %v916_v19 = vsel %vm1770_vm4, %v913_v39, %v910_v9  ;;  %1484 = vpow2.f32 %v892_v7  ;;  %v977_v39 = vand.u32 2147483647, %v1781_v48 }
 0x2d0   : > { %v1473_v23 = vpop.eup %1472  ;;  %v1052_v24 = vadd.f32 %v916_v19, %v828_v56  ;;  %v937_v28 = vmul.f32 0.6931472, %v1471_v16  ;;  %v898_v40 = vmul.f32 1.442695, %v871_v32  ;;  %v857_v47 = vand.u32 2147483647, %v1823_v37 }
 0x2d1   : > { %v1069_v54 = vsel %vm827_vm2, %v1053_v27, %v1706_v10  ;;  %v928_v34 = vmul.f32 0.6931472, %v1473_v23  ;;  %v949_v51 = vmul.f32 %v1766_v30, %v948_v5  ;;  %v870_v55 = vsub.f32 0.0, %v854_v45 }
 0x2d2   : > { %1085 = vst.msk [vmem:[%s1805_s15 + $0x8] sm:$0xff] %vm204_vm0, %v1069_v54  ;;  %v1068_v56 = vsel %vm827_vm2, %v1052_v24, %v1709_v12  ;;  %v943_v0 = vsel %vm1777_vm5, %v940_v58, %v937_v28  ;;  %1486 = vpow2.f32 %v898_v40  ;;  %vm1854_vm9 = vcmp.lt.f32.partialorder %v977_v39, 0.0004427343 }
 0x2d3   : > { %v1475_v42 = vpop.eup %1474  ;;  %1084 = vst.msk [vmem:[%s1805_s15] sm:$0xff] %vm204_vm0, %v1068_v56  ;;  %v1055_v10 = vadd.f32 %v943_v0, %v831_v57  ;;  %v934_v13 = vsel %vm1787_vm6, %v931_v59, %v928_v34  ;;  %v976_v2 = vmul.f32 %v1781_v48, %v975_v22  ;;  %v873_v9 = vsub.f32 0.0, %v857_v47 }
 0x2d4   : > { %v1477_v12 = vpop.eup %1476  ;;  %v1054_v44 = vadd.f32 %v934_v13, %v830_v26  ;;  %v955_v46 = vmul.f32 0.6931472, %v1475_v42  ;;  %v1867_v14 = vadd.f32 %v1757_v29, %v1703_v8  ;;  %v896_v1 = vmul.f32 1.442695, %v870_v55 }
 0x2d5   : > { %v1071_v49 = vsel %vm827_vm2, %v1055_v10, %v1714_v17  ;;  %v946_v57 = vmul.f32 0.6931472, %v1477_v12  ;;  %v1479_v58 = vpop.eup %1478  ;;  %v1898_v32 = vadd.f32 %v1768_v36, %v1703_v8  ;;  %v834_v34 = vmax.f32 %v1733_v41, 0.0 }
 0x2d6   : > { %1087 = vst.msk [vmem:[%s1805_s15 + $0x18] sm:$0xff] %vm204_vm0, %v1071_v49  ;;  %v1070_v59 = vsel %vm827_vm2, %v1054_v44, %v1717_v18  ;;  %v961_v26 = vsel %vm1793_vm7, %v958_v35, %v955_v46  ;;  %v962_v18 = vadd.f32 1.0, %v1479_v58  ;;  %v965_v15 = vmul.f32 -0.5, %v1479_v58 }
 0x2d7   : > { %v1481_v17 = vpop.eup %1480  ;;  %1086 = vst.msk [vmem:[%s1805_s15 + $0x10] sm:$0xff] %vm204_vm0, %v1070_v59  ;;  %v1057_v30 = vadd.f32 %v961_v26, %v833_v62  ;;  %v952_v63 = vsel %vm951_vm8, %v949_v51, %v946_v57  ;;  %v856_v16 = vand.u32 2147483647, %v1867_v14  ;;  %v968_v54 = vand.u32 2147483647, %v1479_v58 }
 0x2d8   : > { %v1483_v3 = vpop.eup %1482  ;;  %v1056_v6 = vadd.f32 %v952_v63, %v832_v11  ;;  %v973_v7 = vmul.f32 0.6931472, %v1481_v17  ;;  %1488 = vlog2.f32 %v962_v18  ;;  %v966_v23 = vadd.f32 1.0, %v965_v15 }
 0x2d9   : > { %v1869_v61 = vpop.eup %1484  ;;  %v1073_v62 = vsel %vm827_vm2, %v1057_v30, %v1722_v25  ;;  %v989_v48 = vadd.f32 1.0, %v1483_v3  ;;  %v992_v21 = vmul.f32 -0.5, %v1483_v3  ;;  %v872_v28 = vsub.f32 0.0, %v856_v16 }
 0x2da   : > { %1089 = vst.msk [vmem:[%s1805_s15 + $0x28] sm:$0xff] %vm204_vm0, %v1073_v62  ;;  %v1072_v11 = vsel %vm827_vm2, %v1056_v6, %v1725_v31  ;;  %v979_v29 = vsel %vm1854_vm9, %v976_v2, %v973_v7  ;;  %v980_v25 = vadd.f32 1.0, %v1869_v61  ;;  %v902_v31 = vmul.f32 1.442695, %v873_v9 }
 0x2db   : > { %1088 = vst.msk [vmem:[%s1805_s15 + $0x20] sm:$0xff] %vm204_vm0, %v1072_v11  ;;  %v1059_v5 = vadd.f32 %v979_v29, %v835_v20  ;;  %1490 = vlog2.f32 %v989_v48  ;;  %v983_v20 = vmul.f32 -0.5, %v1869_v61  ;;  %v993_v35 = vadd.f32 1.0, %v992_v21 }
 0x2dc   : > { %1492 = vpow2.f32 %v896_v1  ;;  %v1890_v19 = vpop.eup %1486  ;;  %v900_v56 = vmul.f32 1.442695, %v872_v28  ;;  %v859_v0 = vand.u32 2147483647, %v1898_v32  ;;  %v967_v40 = vmul.f32 %v1479_v58, %v966_v23 }
 0x2dd   : > { %v1075_v27 = vsel %vm827_vm2, %v1059_v5, %v1730_v38  ;;  %1494 = vlog2.f32 %v980_v25  ;;  %v1007_v24 = vadd.f32 1.0, %v1890_v19  ;;  %v1902_v38 = vadd.f32 %v1775_v43, %v1703_v8 }
 0x2de   : > { %1091 = vst.msk [vmem:[%s1805_s15 + $0x38] sm:$0xff] %vm204_vm0, %v1075_v27  ;;  %1496 = vpow2.f32 %v902_v31  ;;  %v995_v42 = vand.u32 2147483647, %v1483_v3  ;;  %v984_v10 = vadd.f32 1.0, %v983_v20  ;;  %v1010_v22 = vmul.f32 -0.5, %v1890_v19 }
 0x2df   : > { %1498 = vlog2.f32 %v1007_v24  ;;  %v858_v13 = vand.u32 2147483647, %v1902_v38  ;;  %v875_v8 = vsub.f32 0.0, %v859_v0  ;;  %vm969_vm10 = vcmp.lt.f32.partialorder %v968_v54, 0.0004427343 }
 0x2e0   : > { %1500 = vpow2.f32 %v900_v56  ;;  %v837_v45 = vmax.f32 %v1741_v52, 0.0  ;;  %v986_v12 = vand.u32 2147483647, %v1869_v61  ;;  %v994_v49 = vmul.f32 %v1483_v3, %v993_v35 }
 0x2e1   : > { %v874_v44 = vsub.f32 0.0, %v858_v13  ;;  %v906_v57 = vmul.f32 1.442695, %v875_v8  ;;  %vm996_vm11 = vcmp.lt.f32.partialorder %v995_v42, 0.0004427343  ;;  %v985_v58 = vmul.f32 %v1869_v61, %v984_v10 }
 0x2e2   : > { %v1489_v39 = vpop.eup %1488  ;;  %v1013_v59 = vand.u32 2147483647, %v1890_v19  ;;  %v1011_v17 = vadd.f32 1.0, %v1010_v22  ;;  %v836_v7 = vmax.f32 %v1752_v4, 0.0  ;;  %vm987_vm12 = vcmp.lt.f32.partialorder %v986_v12, 0.0004427343 }
 0x2e3   : > { %v964_v36 = vmul.f32 0.6931472, %v1489_v39  ;;  %v904_v63 = vmul.f32 1.442695, %v874_v44  ;;  %1502 = vpow2.f32 %v906_v57  ;;  %v839_v29 = vmax.f32 %v1785_v53, 0.0 }
 0x2e4   : > { %v1012_v11 = vmul.f32 %v1890_v19, %v1011_v17  ;;  %vm1014_vm13 = vcmp.lt.f32.partialorder %v1013_v59, 0.0004427343  ;;  %v838_v39 = vmax.f32 %v1816_v33, 0.0  ;;  %v841_v42 = vmax.f32 %v1823_v37, 0.0 }
 0x2e5   : > { %v1491_v43 = vpop.eup %1490  ;;  %v970_v46 = vsel %vm969_vm10, %v967_v40, %v964_v36 }
 0x2e6   : > { %v991_v47 = vmul.f32 0.6931472, %v1491_v43  ;;  %v1493_v51 = vpop.eup %1492  ;;  %v1058_v55 = vadd.f32 %v970_v46, %v834_v34 }
 0x2e7   : > { %v1495_v26 = vpop.eup %1494  ;;  %v998_v30 = vadd.f32 1.0, %v1493_v51  ;;  %v1001_v5 = vmul.f32 -0.5, %v1493_v51  ;;  %v1004_v23 = vand.u32 2147483647, %v1493_v51 }
 0x2e8   : > { %v997_v60 = vsel %vm996_vm11, %v994_v49, %v991_v47  ;;  %v1497_v2 = vpop.eup %1496  ;;  %v1074_v18 = vsel %vm827_vm2, %v1058_v55, %v1733_v41  ;;  %v982_v6 = vmul.f32 0.6931472, %v1495_v26  ;;  %v840_v55 = vmax.f32 %v1867_v14, 0.0 }
 0x2e9   : > { %v1061_v3 = vadd.f32 %v997_v60, %v837_v45  ;;  %1090 = vst.msk [vmem:[%s1805_s15 + $0x30] sm:$0xff] %vm204_vm0, %v1074_v18  ;;  %1504 = vlog2.f32 %v998_v30  ;;  %v1025_v9 = vadd.f32 1.0, %v1497_v2  ;;  %v1499_v61 = vpop.eup %1498  ;;  %v1028_v27 = vmul.f32 -0.5, %v1497_v2 }
 0x2ea   : > { %v988_v48 = vsel %vm987_vm12, %v985_v58, %v982_v6  ;;  %v1009_v1 = vmul.f32 0.6931472, %v1499_v61  ;;  %v1501_v15 = vpop.eup %1500  ;;  %v1002_v21 = vadd.f32 1.0, %v1001_v5  ;;  %v1031_v54 = vand.u32 2147483647, %v1497_v2 }
 0x2eb   : > { %v1077_v62 = vsel %vm827_vm2, %v1061_v3, %v1741_v52  ;;  %v1060_v41 = vadd.f32 %v988_v48, %v836_v7  ;;  %1506 = vlog2.f32 %v1025_v9  ;;  %v1016_v31 = vadd.f32 1.0, %v1501_v15 }
 0x2ec   : > { %1093 = vst.msk [vmem:[%s1805_s15 + $0x48] sm:$0xff] %vm204_vm0, %v1077_v62  ;;  %1508 = vpow2.f32 %v904_v63  ;;  %v1015_v52 = vsel %vm1014_vm13, %v1012_v11, %v1009_v1  ;;  %v1029_v24 = vadd.f32 1.0, %v1028_v27  ;;  %v1003_v56 = vmul.f32 %v1493_v51, %v1002_v21 }
 0x2ed   : > { %v1076_v25 = vsel %vm827_vm2, %v1060_v41, %v1752_v4  ;;  %v1063_v16 = vadd.f32 %v1015_v52, %v839_v29  ;;  %1510 = vlog2.f32 %v1016_v31  ;;  %v1503_v20 = vpop.eup %1502  ;;  %v1019_v4 = vmul.f32 -0.5, %v1501_v15 }
 0x2ee   : > { %1092 = vst.msk [vmem:[%s1805_s15 + $0x40] sm:$0xff] %vm204_vm0, %v1076_v25  ;;  %v1043_v34 = vadd.f32 1.0, %v1503_v20  ;;  %vm1005_vm14 = vcmp.lt.f32.partialorder %v1004_v23, 0.0004427343  ;;  %v1030_v13 = vmul.f32 %v1497_v2, %v1029_v24  ;;  %vm1032_vm15 = vcmp.lt.f32.partialorder %v1031_v54, 0.0004427343 }
 0x2ef   : > { %v1079_v19 = vsel %vm827_vm2, %v1063_v16, %v1785_v53  ;;  %v1020_v22 = vadd.f32 1.0, %v1019_v4  ;;  %v1022_v45 = vand.u32 2147483647, %v1501_v15  ;;  %v1046_v12 = vmul.f32 -0.5, %v1503_v20 }
 0x2f0   : > { %1095 = vst.msk [vmem:[%s1805_s15 + $0x58] sm:$0xff] %vm204_vm0, %v1079_v19  ;;  %1512 = vlog2.f32 %v1043_v34  ;;  %v1049_v26 = vand.u32 2147483647, %v1503_v20  ;;  %v843_v18 = vmax.f32 %v1898_v32, 0.0  ;;  %v842_v48 = vmax.f32 %v1902_v38, 0.0 }
 0x2f1   : > { %v1021_v51 = vmul.f32 %v1501_v15, %v1020_v22  ;;  %vm1023_vm1 = vcmp.lt.f32.partialorder %v1022_v45, 0.0004427343  ;;  %v1047_v58 = vadd.f32 1.0, %v1046_v12 }
 0x2f2   : > { %vm1050_vm3 = vcmp.lt.f32.partialorder %v1049_v26, 0.0004427343 }
 0x2f3   : > { %v1505_v28 = vpop.eup %1504  ;;  %v1048_v63 = vmul.f32 %v1503_v20, %v1047_v58 }
 0x2f4   : > { %v1000_v35 = vmul.f32 0.6931472, %v1505_v28 }
 0x2f5   : > { %v1507_v0 = vpop.eup %1506 }
 0x2f6   : > { %v1509_v40 = vpop.eup %1508  ;;  %v1006_v53 = vsel %vm1005_vm14, %v1003_v56, %v1000_v35  ;;  %v1027_v10 = vmul.f32 0.6931472, %v1507_v0 }
 0x2f7   : > { %v1062_v36 = vadd.f32 %v1006_v53, %v838_v39  ;;  %v1034_v8 = vadd.f32 1.0, %v1509_v40  ;;  %v1511_v47 = vpop.eup %1510  ;;  %v1037_v59 = vmul.f32 -0.5, %v1509_v40  ;;  %v1040_v3 = vand.u32 2147483647, %v1509_v40 }
 0x2f8   : > { %v1033_v43 = vsel %vm1032_vm15, %v1030_v13, %v1027_v10  ;;  %v1018_v57 = vmul.f32 0.6931472, %v1511_v47 }
 0x2f9   : > { %v1078_v44 = vsel %vm827_vm2, %v1062_v36, %v1816_v33  ;;  %v1065_v46 = vadd.f32 %v1033_v43, %v841_v42  ;;  %1514 = vlog2.f32 %v1034_v8  ;;  %v1038_v2 = vadd.f32 1.0, %v1037_v59 }
 0x2fa   : > { %1094 = vst.msk [vmem:[%s1805_s15 + $0x50] sm:$0xff] %vm204_vm0, %v1078_v44  ;;  %v1024_v33 = vsel %vm1023_vm1, %v1021_v51, %v1018_v57  ;;  %v1513_v17 = vpop.eup %1512  ;;  %vm1041_vm4 = vcmp.lt.f32.partialorder %v1040_v3, 0.0004427343 }
 0x2fb   : > { %v1081_v49 = vsel %vm827_vm2, %v1065_v46, %v1823_v37  ;;  %v1064_v60 = vadd.f32 %v1024_v33, %v840_v55  ;;  %v1045_v37 = vmul.f32 0.6931472, %v1513_v17  ;;  %v1039_v62 = vmul.f32 %v1509_v40, %v1038_v2 }
 0x2fc   : > { %1097 = vst.msk [vmem:[%s1805_s15 + $0x68] sm:$0xff] %vm204_vm0, %v1081_v49 }
 0x2fd   : > { %v1080_v30 = vsel %vm827_vm2, %v1064_v60, %v1867_v14  ;;  %v1051_v6 = vsel %vm1050_vm3, %v1048_v63, %v1045_v37 }
 0x2fe   : > { %1096 = vst.msk [vmem:[%s1805_s15 + $0x60] sm:$0xff] %vm204_vm0, %v1080_v30  ;;  %v1067_v9 = vadd.f32 %v1051_v6, %v843_v18 }
 0x300   : > { %v1083_v14 = vsel %vm827_vm2, %v1067_v9, %v1898_v32 }
 0x301   : > { %1099 = vst.msk [vmem:[%s1805_s15 + $0x78] sm:$0xff] %vm204_vm0, %v1083_v14 }
 0x303   : > { %v1515_v7 = vpop.eup %1514 }
 0x304   : > { %v1036_v61 = vmul.f32 0.6931472, %v1515_v7 }
 0x306   : > { %v1042_v41 = vsel %vm1041_vm4, %v1039_v62, %v1036_v61 }
 0x307   : > { %v1066_v1 = vadd.f32 %v1042_v41, %v842_v48 }
 0x309   : > { %v1082_v11 = vsel %vm827_vm2, %v1066_v1, %v1902_v38 }
 0x30a   : > { %1098 = vst.msk [vmem:[%s1805_s15 + $0x70] sm:$0xff] %vm204_vm0, %v1082_v11 }
 0x30b PF: > { %s13_s12 = sadd.s32 1, %s1522_s12  }
 0x30c   : > { %p10_p4 = scmp.ge.s32.totalorder %s13_s12, 4  }
 0x30e   :  { %12 = sbr.rel (!%p10_p4) target bundleno = 1 (0x1), region = 62 }

</bundles_post_ra>
